<compile_context>
chip_gen: v5e
topology: v5e:2x2
jax: 0.10.0
libtpu: 0.0.40
codegen_flags: <defaults>
</compile_context>

<pallas_src>
import functools

import jax
import jax.numpy as jnp
from jax import lax
from jax.experimental import pallas as pl
from jax.experimental.pallas import tpu as pltpu


_TK_TARGET = 512  # lane tile for the feature axis (measured sweet spot)


def _round_up(x, m):
    return ((x + m - 1) // m) * m


def _mkmmd_kernel(src_ref, tgt_ref, out_ref, gram_acc, l1_acc, *,
                  batch_size, kernel_mul, kernel_num, fix_sigma):
    k = pl.program_id(0)

    @pl.when(k == 0)
    def _init():
        gram_acc[...] = jnp.zeros_like(gram_acc)
        l1_acc[...] = jnp.zeros_like(l1_acc)

    s = src_ref[...].astype(jnp.float32)          # (Bs, tk)
    t = tgt_ref[...].astype(jnp.float32)          # (Bt, tk)
    tot = jnp.concatenate([s, t], axis=0)         # (N, tk) — in-VMEM stack
    n = tot.shape[0]

    # ---- L2 building block: Gram matrix on the MXU (vmatmul slot is free) --
    gram_acc[...] += lax.dot_general(
        tot, tot,
        dimension_numbers=(((1,), (1,)), ((), ())),   # contract lane axis
        preferred_element_type=jnp.float32,
        precision=lax.Precision.HIGHEST)

    # ---- L1 partial sums: per-row lane reduce, assembled via one-hot columns
    #      (avoids N lane-axis concats / relayout churn on the XLU). ---------
    col = lax.broadcasted_iota(jnp.int32, (1, n), 1)
    l1_part = jnp.zeros((n, n), jnp.float32)
    # TODO(synk): for large batch sizes switch this static unroll to
    # lax.fori_loop(..., unroll=2) to bound vreg live ranges.
    for i in range(n):
        di = jnp.sum(jnp.abs(tot - tot[i:i + 1, :]), axis=1, keepdims=True)
        l1_part = l1_part + di * (col == i).astype(jnp.float32)
    l1_acc[...] += l1_part

    # ---- Epilogue: bandwidths, 2*kernel_num exponentials, signed reduce. ---
    @pl.when(k == pl.num_programs(0) - 1)
    def _finish():
        gram = gram_acc[...]                      # (N, N)
        l1 = l1_acc[...]                          # (N, N)

        row_i = lax.broadcasted_iota(jnp.int32, (n, n), 0)
        col_i = lax.broadcasted_iota(jnp.int32, (n, n), 1)
        eye = (row_i == col_i).astype(jnp.float32)
        sq_r = jnp.sum(gram * eye, axis=1, keepdims=True)   # (N, 1) diag
        sq_c = jnp.sum(gram * eye, axis=0, keepdims=True)   # (1, N) diag
        # Clamp: guards tiny negatives from cancellation; diagonal is exact 0.
        l2 = jnp.maximum(sq_r + sq_c - 2.0 * gram, 0.0)

        n_pairs = float(n * n - n)
        denom = float(kernel_mul) ** (kernel_num // 2)
        if fix_sigma:
            bw_l2 = jnp.float32(float(fix_sigma) / denom)
            bw_l1 = jnp.float32(float(fix_sigma) / denom)
        else:
            bw_l2 = (jnp.sum(l2) / n_pairs) / denom
            bw_l1 = (jnp.sum(l1) / n_pairs) / denom

        # One exact scalar reciprocal per distance type; vector side only
        # sees multiplies (keeps the EUP free for the exps).
        neg_inv_l2 = -1.0 / bw_l2
        neg_inv_l1 = -1.0 / bw_l1

        kern = jnp.zeros((n, n), jnp.float32)
        for i in range(kernel_num):
            inv_scale = float(kernel_mul) ** (-i)
            kern = kern + jnp.exp(l2 * (neg_inv_l2 * inv_scale))  # gaussian
            kern = kern + jnp.exp(l1 * (neg_inv_l1 * inv_scale))  # laplacian

        # loss = mean(XX + YY - XY - YX) = sum(kernels * sign) / B^2
        same = (row_i < batch_size) == (col_i < batch_size)
        sign = jnp.where(same, 1.0, -1.0).astype(jnp.float32)
        loss = jnp.sum(kern * sign) / jnp.float32(batch_size * batch_size)

        out_ref[...] = jnp.zeros_like(out_ref) + loss   # lane-dense store


def mkmmd_loss(source, target, kernel_mul=10.0, kernel_num=5, fix_sigma=None):
    bs = source.shape[0]
    bt = target.shape[0]
    s = source.reshape(bs, -1).astype(jnp.float32)
    t = target.reshape(bt, -1).astype(jnp.float32)
    if s.shape[1] != t.shape[1]:
        raise ValueError("source/target feature dims must match")
    d = s.shape[1]
    n = bs + bt

    # Choose the feature-axis tile: lane-aligned, and a divisor of the padded
    # feature width so every grid block is full (zero-padding D is exact for
    # Gram / L1 / row-norms since both rows get identical zeros).
    d128 = _round_up(d, 128)
    tk = d128 if d128 <= _TK_TARGET else _TK_TARGET
    dp = _round_up(d, tk)
    if dp != d:
        s = jnp.pad(s, ((0, 0), (0, dp - d)))
        t = jnp.pad(t, ((0, 0), (0, dp - d)))
    num_k = dp // tk

    kernel = functools.partial(
        _mkmmd_kernel,
        batch_size=bs,
        kernel_mul=float(kernel_mul),
        kernel_num=int(kernel_num),
        fix_sigma=fix_sigma,
    )

    out = pl.pallas_call(
        kernel,
        out_shape=jax.ShapeDtypeStruct((1, 128), jnp.float32),
        grid_spec=pltpu.PrefetchScalarGridSpec(
            num_scalar_prefetch=0,
            grid=(num_k,),
            in_specs=[
                pl.BlockSpec((bs, tk), lambda k: (0, k)),
                pl.BlockSpec((bt, tk), lambda k: (0, k)),
            ],
            out_specs=pl.BlockSpec((1, 128), lambda k: (0, 0)),
            scratch_shapes=[
                pltpu.VMEM((n, n), jnp.float32),   # Gram accumulator
                pltpu.VMEM((n, n), jnp.float32),   # L1 accumulator
            ],
        ),
        compiler_params=pltpu.CompilerParams(
            dimension_semantics=("arbitrary",)),
    )(s, t)
    return out[0, 0]


def mkmmd_ref(source, target, kernel_mul=10.0, kernel_num=5, fix_sigma=None):
    """Pure-JAX reference mirroring the PyTorch module exactly."""
    b = source.shape[0]
    s = source.reshape(b, -1).astype(jnp.float32)
    t = target.reshape(target.shape[0], -1).astype(jnp.float32)
    total = jnp.concatenate([s, t], axis=0)
    n = total.shape[0]
    total0 = total[None, :, :]
    total1 = total[:, None, :]

    def multi_kernel(dist):
        if fix_sigma:
            bw = jnp.float32(fix_sigma)
        else:
            bw = jnp.sum(dist) / (n * n - n)
        bw = bw / (kernel_mul ** (kernel_num // 2))
        vals = [jnp.exp(-dist / (bw * kernel_mul ** i)) for i in range(kernel_num)]
        return sum(vals)

    L2 = jnp.sum((total0 - total1) ** 2, axis=2)
    L1 = jnp.sum(jnp.abs(total0 - total1), axis=2)
    kernels = multi_kernel(L2) + multi_kernel(L1)
    XX = kernels[:b, :b]
    YY = kernels[b:, b:]
    XY = kernels[:b, b:]
    YX = kernels[b:, :b]
    return jnp.mean(XX + YY - XY - YX)


if __name__ == "__main__":
    key = jax.random.PRNGKey(0)
    k1, k2 = jax.random.split(key)
    # NCHW inputs, as the PyTorch module would receive.
    source = jax.random.normal(k1, (2, 4, 16, 16), dtype=jnp.float32)
    target = jax.random.normal(k2, (2, 4, 16, 16), dtype=jnp.float32) + 0.5

    loss = jax.block_until_ready(mkmmd_loss(source, target))
    ref = jax.block_until_ready(mkmmd_ref(source, target))

    assert jnp.isfinite(loss), "kernel produced non-finite loss"
    assert jnp.allclose(loss, ref, rtol=1e-3, atol=1e-4), (loss, ref)
    print("KERNEL_OK")
</pallas_src>

<mosaic_0001>
module attributes {stable_mosaic.version = 11 : i64} {
  func.func @_mkmmd_kernel(%arg0: i32, %arg1: memref<2x512xf32, #tpu.memory_space<vmem>>, %arg2: memref<2x512xf32, #tpu.memory_space<vmem>>, %arg3: memref<1x128xf32, #tpu.memory_space<vmem>>, %arg4: memref<4x4xf32, #tpu.memory_space<vmem>>, %arg5: memref<4x4xf32, #tpu.memory_space<vmem>>) attributes {dimension_semantics = [#tpu.dimension_semantics<arbitrary>], iteration_bounds = array<i64: 2>, scalar_prefetch = 0 : i64, scratch_operands = 2 : i64, tpu.core_type = #tpu.core_type<tc>, window_params = [{transform_indices = @transform_0, window_bounds = array<i64: 2, 512>}, {transform_indices = @transform_1, window_bounds = array<i64: 2, 512>}, {pipeline_mode = #tpu.pipeline_mode<synchronous>, transform_indices = @transform_2, window_bounds = array<i64: 1, 128>}]} {
    %c0_i32 = arith.constant 0 : i32
    %0 = arith.cmpi eq, %arg0, %c0_i32 : i32
    %1 = arith.extui %0 : i1 to i32
    %c0_i32_0 = arith.constant 0 : i32
    %2 = arith.cmpi ne, %1, %c0_i32_0 : i32
    scf.if %2 {
      %cst_20 = arith.constant 0.000000e+00 : f32
      %74 = vector.broadcast %cst_20 : f32 to vector<4x4xf32>
      %c0_21 = arith.constant 0 : index
      %c0_22 = arith.constant 0 : index
      %75 = vector.load %arg4[%c0_21, %c0_22] : memref<4x4xf32, #tpu.memory_space<vmem>>, vector<4x4xf32>
      tpu.vector_store %arg4[%c0_21, %c0_22], %74 {strides = array<i32>} : memref<4x4xf32, #tpu.memory_space<vmem>>, vector<4x4xf32>,
      %cst_23 = arith.constant 0.000000e+00 : f32
      %76 = vector.broadcast %cst_23 : f32 to vector<4x4xf32>
      %c0_24 = arith.constant 0 : index
      %c0_25 = arith.constant 0 : index
      %77 = vector.load %arg5[%c0_24, %c0_25] : memref<4x4xf32, #tpu.memory_space<vmem>>, vector<4x4xf32>
      tpu.vector_store %arg5[%c0_24, %c0_25], %76 {strides = array<i32>} : memref<4x4xf32, #tpu.memory_space<vmem>>, vector<4x4xf32>,
    } else {
    }
    %c0 = arith.constant 0 : index
    %c0_1 = arith.constant 0 : index
    %3 = vector.load %arg1[%c0, %c0_1] : memref<2x512xf32, #tpu.memory_space<vmem>>, vector<2x512xf32>
    %c0_2 = arith.constant 0 : index
    %c0_3 = arith.constant 0 : index
    %4 = vector.load %arg2[%c0_2, %c0_3] : memref<2x512xf32, #tpu.memory_space<vmem>>, vector<2x512xf32>
    %5 = tpu.concatenate %3, %4 in 0 : vector<2x512xf32>, vector<2x512xf32> -> vector<4x512xf32>
    %c0_4 = arith.constant 0 : index
    %c0_5 = arith.constant 0 : index
    %6 = vector.load %arg4[%c0_4, %c0_5] : memref<4x4xf32, #tpu.memory_space<vmem>>, vector<4x4xf32>
    %cst = arith.constant dense<0.000000e+00> : vector<4x4xf32>
    %7 = tpu.matmul %5, %5, %cst {dimension_numbers = #tpu.dot_dimension_numbers<[1], [1], [0], [0], [0, 0, 1, 0], [], []>, precision = #tpu.contract_precision<fp32>} : vector<4x512xf32>, vector<4x512xf32>, vector<4x4xf32> -> vector<4x4xf32>
    %8 = arith.addf %6, %7 : vector<4x4xf32>
    %c0_6 = arith.constant 0 : index
    %c0_7 = arith.constant 0 : index
    %9 = vector.load %arg4[%c0_6, %c0_7] : memref<4x4xf32, #tpu.memory_space<vmem>>, vector<4x4xf32>
    tpu.vector_store %arg4[%c0_6, %c0_7], %8 {strides = array<i32>} : memref<4x4xf32, #tpu.memory_space<vmem>>, vector<4x4xf32>,
    %10 = tpu.iota {dimensions = array<i32: 1>} : vector<1x4xi32>
    %cst_8 = arith.constant 0.000000e+00 : f32
    %11 = vector.broadcast %cst_8 : f32 to vector<4x4xf32>
    %12 = vector.extract_strided_slice %5 {offsets = [0, 0], sizes = [1, 512], strides = [1, 1]} : vector<4x512xf32> to vector<1x512xf32>
    %13 = vector.broadcast %12 : vector<1x512xf32> to vector<4x512xf32>
    %14 = arith.subf %5, %13 : vector<4x512xf32>
    %15 = math.absf %14 : vector<4x512xf32>
    %cst_9 = arith.constant dense<0.000000e+00> : vector<4xf32>
    %16 = vector.multi_reduction <add>, %15, %cst_9 [1] : vector<4x512xf32> to vector<4xf32>
    %17 = vector.shape_cast %16 : vector<4xf32> to vector<4x1xf32>
    %c0_i32_10 = arith.constant 0 : i32
    %18 = vector.broadcast %c0_i32_10 : i32 to vector<1x4xi32>
    %19 = arith.cmpi eq, %10, %18 : vector<1x4xi32>
    %20 = arith.extui %19 : vector<1x4xi1> to vector<1x4xi32>
    %21 = arith.sitofp %20 : vector<1x4xi32> to vector<1x4xf32>
    %22 = vector.broadcast %17 : vector<4x1xf32> to vector<4x4xf32>
    %23 = vector.broadcast %21 : vector<1x4xf32> to vector<4x4xf32>
    %24 = arith.mulf %22, %23 : vector<4x4xf32>
    %25 = arith.addf %11, %24 : vector<4x4xf32>
    %26 = vector.extract_strided_slice %5 {offsets = [1, 0], sizes = [1, 512], strides = [1, 1]} : vector<4x512xf32> to vector<1x512xf32>
    %27 = vector.broadcast %26 : vector<1x512xf32> to vector<4x512xf32>
    %28 = arith.subf %5, %27 : vector<4x512xf32>
    %29 = math.absf %28 : vector<4x512xf32>
    %cst_11 = arith.constant dense<0.000000e+00> : vector<4xf32>
    %30 = vector.multi_reduction <add>, %29, %cst_11 [1] : vector<4x512xf32> to vector<4xf32>
    %31 = vector.shape_cast %30 : vector<4xf32> to vector<4x1xf32>
    %c1_i32 = arith.constant 1 : i32
    %32 = vector.broadcast %c1_i32 : i32 to vector<1x4xi32>
    %33 = arith.cmpi eq, %10, %32 : vector<1x4xi32>
    %34 = arith.extui %33 : vector<1x4xi1> to vector<1x4xi32>
    %35 = arith.sitofp %34 : vector<1x4xi32> to vector<1x4xf32>
    %36 = vector.broadcast %31 : vector<4x1xf32> to vector<4x4xf32>
    %37 = vector.broadcast %35 : vector<1x4xf32> to vector<4x4xf32>
    %38 = arith.mulf %36, %37 : vector<4x4xf32>
    %39 = arith.addf %25, %38 : vector<4x4xf32>
    %40 = vector.extract_strided_slice %5 {offsets = [2, 0], sizes = [1, 512], strides = [1, 1]} : vector<4x512xf32> to vector<1x512xf32>
    %41 = vector.broadcast %40 : vector<1x512xf32> to vector<4x512xf32>
    %42 = arith.subf %5, %41 : vector<4x512xf32>
    %43 = math.absf %42 : vector<4x512xf32>
    %cst_12 = arith.constant dense<0.000000e+00> : vector<4xf32>
    %44 = vector.multi_reduction <add>, %43, %cst_12 [1] : vector<4x512xf32> to vector<4xf32>
    %45 = vector.shape_cast %44 : vector<4xf32> to vector<4x1xf32>
    %c2_i32 = arith.constant 2 : i32
    %46 = vector.broadcast %c2_i32 : i32 to vector<1x4xi32>
    %47 = arith.cmpi eq, %10, %46 : vector<1x4xi32>
    %48 = arith.extui %47 : vector<1x4xi1> to vector<1x4xi32>
    %49 = arith.sitofp %48 : vector<1x4xi32> to vector<1x4xf32>
    %50 = vector.broadcast %45 : vector<4x1xf32> to vector<4x4xf32>
    %51 = vector.broadcast %49 : vector<1x4xf32> to vector<4x4xf32>
    %52 = arith.mulf %50, %51 : vector<4x4xf32>
    %53 = arith.addf %39, %52 : vector<4x4xf32>
    %54 = vector.extract_strided_slice %5 {offsets = [3, 0], sizes = [1, 512], strides = [1, 1]} : vector<4x512xf32> to vector<1x512xf32>
    %55 = vector.broadcast %54 : vector<1x512xf32> to vector<4x512xf32>
    %56 = arith.subf %5, %55 : vector<4x512xf32>
    %57 = math.absf %56 : vector<4x512xf32>
    %cst_13 = arith.constant dense<0.000000e+00> : vector<4xf32>
    %58 = vector.multi_reduction <add>, %57, %cst_13 [1] : vector<4x512xf32> to vector<4xf32>
    %59 = vector.shape_cast %58 : vector<4xf32> to vector<4x1xf32>
    %c3_i32 = arith.constant 3 : i32
    %60 = vector.broadcast %c3_i32 : i32 to vector<1x4xi32>
    %61 = arith.cmpi eq, %10, %60 : vector<1x4xi32>
    %62 = arith.extui %61 : vector<1x4xi1> to vector<1x4xi32>
    %63 = arith.sitofp %62 : vector<1x4xi32> to vector<1x4xf32>
    %64 = vector.broadcast %59 : vector<4x1xf32> to vector<4x4xf32>
    %65 = vector.broadcast %63 : vector<1x4xf32> to vector<4x4xf32>
    %66 = arith.mulf %64, %65 : vector<4x4xf32>
    %67 = arith.addf %53, %66 : vector<4x4xf32>
    %c0_14 = arith.constant 0 : index
    %c0_15 = arith.constant 0 : index
    %68 = vector.load %arg5[%c0_14, %c0_15] : memref<4x4xf32, #tpu.memory_space<vmem>>, vector<4x4xf32>
    %69 = arith.addf %68, %67 : vector<4x4xf32>
    %c0_16 = arith.constant 0 : index
    %c0_17 = arith.constant 0 : index
    %70 = vector.load %arg5[%c0_16, %c0_17] : memref<4x4xf32, #tpu.memory_space<vmem>>, vector<4x4xf32>
    tpu.vector_store %arg5[%c0_16, %c0_17], %69 {strides = array<i32>} : memref<4x4xf32, #tpu.memory_space<vmem>>, vector<4x4xf32>,
    %c1_i32_18 = arith.constant 1 : i32
    %71 = arith.cmpi eq, %arg0, %c1_i32_18 : i32
    %72 = arith.extui %71 : i1 to i32
    %c0_i32_19 = arith.constant 0 : i32
    %73 = arith.cmpi ne, %72, %c0_i32_19 : i32
    scf.if %73 {
      %c0_20 = arith.constant 0 : index
      %c0_21 = arith.constant 0 : index
      %74 = vector.load %arg4[%c0_20, %c0_21] : memref<4x4xf32, #tpu.memory_space<vmem>>, vector<4x4xf32>
      %c0_22 = arith.constant 0 : index
      %c0_23 = arith.constant 0 : index
      %75 = vector.load %arg5[%c0_22, %c0_23] : memref<4x4xf32, #tpu.memory_space<vmem>>, vector<4x4xf32>
      %76 = tpu.iota {dimensions = array<i32: 0>} : vector<4x4xi32>
      %77 = tpu.iota {dimensions = array<i32: 1>} : vector<4x4xi32>
      %78 = arith.cmpi eq, %76, %77 : vector<4x4xi32>
      %79 = arith.extui %78 : vector<4x4xi1> to vector<4x4xi32>
      %80 = arith.sitofp %79 : vector<4x4xi32> to vector<4x4xf32>
      %81 = arith.mulf %74, %80 : vector<4x4xf32>
      %cst_24 = arith.constant dense<0.000000e+00> : vector<4xf32>
      %82 = vector.multi_reduction <add>, %81, %cst_24 [1] : vector<4x4xf32> to vector<4xf32>
      %83 = vector.shape_cast %82 : vector<4xf32> to vector<4x1xf32>
      %84 = arith.mulf %74, %80 : vector<4x4xf32>
      %cst_25 = arith.constant dense<0.000000e+00> : vector<4xf32>
      %85 = vector.multi_reduction <add>, %84, %cst_25 [0] : vector<4x4xf32> to vector<4xf32>
      %86 = vector.shape_cast %85 : vector<4xf32> to vector<1x4xf32>
      %87 = vector.broadcast %83 : vector<4x1xf32> to vector<4x4xf32>
      %88 = vector.broadcast %86 : vector<1x4xf32> to vector<4x4xf32>
      %89 = arith.addf %87, %88 : vector<4x4xf32>
      %cst_26 = arith.constant 2.000000e+00 : f32
      %90 = vector.broadcast %cst_26 : f32 to vector<4x4xf32>
      %91 = arith.mulf %90, %74 : vector<4x4xf32>
      %92 = arith.subf %89, %91 : vector<4x4xf32>
      %cst_27 = arith.constant 0.000000e+00 : f32
      %93 = vector.broadcast %cst_27 : f32 to vector<4x4xf32>
      %94 = arith.maximumf %92, %93 : vector<4x4xf32>
      %95 = vector.shape_cast %94 : vector<4x4xf32> to vector<1x4x4xf32>
      %cst_28 = arith.constant dense<0.000000e+00> : vector<1xf32>
      %96 = vector.multi_reduction <add>, %95, %cst_28 [1, 2] : vector<1x4x4xf32> to vector<1xf32>
      %97 = vector.shape_cast %96 : vector<1xf32> to vector<1x1x1xf32>
      %98 = vector.extract %97[0, 0, 0] : f32 from vector<1x1x1xf32>
      %cst_29 = arith.constant 1.200000e+01 : f32
      %99 = arith.divf %98, %cst_29 : f32
      %cst_30 = arith.constant 1.000000e+02 : f32
      %100 = arith.divf %99, %cst_30 : f32
      %101 = vector.shape_cast %75 : vector<4x4xf32> to vector<1x4x4xf32>
      %cst_31 = arith.constant dense<0.000000e+00> : vector<1xf32>
      %102 = vector.multi_reduction <add>, %101, %cst_31 [1, 2] : vector<1x4x4xf32> to vector<1xf32>
      %103 = vector.shape_cast %102 : vector<1xf32> to vector<1x1x1xf32>
      %104 = vector.extract %103[0, 0, 0] : f32 from vector<1x1x1xf32>
      %cst_32 = arith.constant 1.200000e+01 : f32
      %105 = arith.divf %104, %cst_32 : f32
      %cst_33 = arith.constant 1.000000e+02 : f32
      %106 = arith.divf %105, %cst_33 : f32
      %cst_34 = arith.constant -1.000000e+00 : f32
      %107 = arith.divf %cst_34, %100 : f32
      %cst_35 = arith.constant -1.000000e+00 : f32
      %108 = arith.divf %cst_35, %106 : f32
      %cst_36 = arith.constant 0.000000e+00 : f32
      %109 = vector.broadcast %cst_36 : f32 to vector<4x4xf32>
      %cst_37 = arith.constant 1.000000e+00 : f32
      %110 = arith.mulf %107, %cst_37 : f32
      %111 = vector.broadcast %110 : f32 to vector<4x4xf32>
      %112 = arith.mulf %94, %111 : vector<4x4xf32>
      %113 = math.exp %112 : vector<4x4xf32>
      %114 = arith.addf %109, %113 : vector<4x4xf32>
      %cst_38 = arith.constant 1.000000e+00 : f32
      %115 = arith.mulf %108, %cst_38 : f32
      %116 = vector.broadcast %115 : f32 to vector<4x4xf32>
      %117 = arith.mulf %75, %116 : vector<4x4xf32>
      %118 = math.exp %117 : vector<4x4xf32>
      %119 = arith.addf %114, %118 : vector<4x4xf32>
      %cst_39 = arith.constant 1.000000e-01 : f32
      %120 = arith.mulf %107, %cst_39 : f32
      %121 = vector.broadcast %120 : f32 to vector<4x4xf32>
      %122 = arith.mulf %94, %121 : vector<4x4xf32>
      %123 = math.exp %122 : vector<4x4xf32>
      %124 = arith.addf %119, %123 : vector<4x4xf32>
      %cst_40 = arith.constant 1.000000e-01 : f32
      %125 = arith.mulf %108, %cst_40 : f32
      %126 = vector.broadcast %125 : f32 to vector<4x4xf32>
      %127 = arith.mulf %75, %126 : vector<4x4xf32>
      %128 = math.exp %127 : vector<4x4xf32>
      %129 = arith.addf %124, %128 : vector<4x4xf32>
      %cst_41 = arith.constant 0.00999999977 : f32
      %130 = arith.mulf %107, %cst_41 : f32
      %131 = vector.broadcast %130 : f32 to vector<4x4xf32>
      %132 = arith.mulf %94, %131 : vector<4x4xf32>
      %133 = math.exp %132 : vector<4x4xf32>
      %134 = arith.addf %129, %133 : vector<4x4xf32>
      %cst_42 = arith.constant 0.00999999977 : f32
      %135 = arith.mulf %108, %cst_42 : f32
      %136 = vector.broadcast %135 : f32 to vector<4x4xf32>
      %137 = arith.mulf %75, %136 : vector<4x4xf32>
      %138 = math.exp %137 : vector<4x4xf32>
      %139 = arith.addf %134, %138 : vector<4x4xf32>
      %cst_43 = arith.constant 1.000000e-03 : f32
      %140 = arith.mulf %107, %cst_43 : f32
      %141 = vector.broadcast %140 : f32 to vector<4x4xf32>
      %142 = arith.mulf %94, %141 : vector<4x4xf32>
      %143 = math.exp %142 : vector<4x4xf32>
      %144 = arith.addf %139, %143 : vector<4x4xf32>
      %cst_44 = arith.constant 1.000000e-03 : f32
      %145 = arith.mulf %108, %cst_44 : f32
      %146 = vector.broadcast %145 : f32 to vector<4x4xf32>
      %147 = arith.mulf %75, %146 : vector<4x4xf32>
      %148 = math.exp %147 : vector<4x4xf32>
      %149 = arith.addf %144, %148 : vector<4x4xf32>
      %cst_45 = arith.constant 9.99999974E-5 : f32
      %150 = arith.mulf %107, %cst_45 : f32
      %151 = vector.broadcast %150 : f32 to vector<4x4xf32>
      %152 = arith.mulf %94, %151 : vector<4x4xf32>
      %153 = math.exp %152 : vector<4x4xf32>
      %154 = arith.addf %149, %153 : vector<4x4xf32>
      %cst_46 = arith.constant 9.99999974E-5 : f32
      %155 = arith.mulf %108, %cst_46 : f32
      %156 = vector.broadcast %155 : f32 to vector<4x4xf32>
      %157 = arith.mulf %75, %156 : vector<4x4xf32>
      %158 = math.exp %157 : vector<4x4xf32>
      %159 = arith.addf %154, %158 : vector<4x4xf32>
      %c2_i32_47 = arith.constant 2 : i32
      %160 = vector.broadcast %c2_i32_47 : i32 to vector<4x4xi32>
      %161 = arith.cmpi slt, %76, %160 : vector<4x4xi32>
      %c2_i32_48 = arith.constant 2 : i32
      %162 = vector.broadcast %c2_i32_48 : i32 to vector<4x4xi32>
      %163 = arith.cmpi slt, %77, %162 : vector<4x4xi32>
      %164 = arith.xori %161, %163 : vector<4x4xi1>
      %cst_49 = arith.constant dense<true> : vector<4x4xi1>
      %165 = arith.xori %164, %cst_49 : vector<4x4xi1>
      %cst_50 = arith.constant 1.000000e+00 : f32
      %cst_51 = arith.constant -1.000000e+00 : f32
      %166 = vector.broadcast %cst_50 : f32 to vector<4x4xf32>
      %167 = vector.broadcast %cst_51 : f32 to vector<4x4xf32>
      %168 = arith.select %165, %166, %167 : vector<4x4xi1>, vector<4x4xf32>
      %169 = arith.mulf %159, %168 : vector<4x4xf32>
      %170 = vector.shape_cast %169 : vector<4x4xf32> to vector<1x4x4xf32>
      %cst_52 = arith.constant dense<0.000000e+00> : vector<1xf32>
      %171 = vector.multi_reduction <add>, %170, %cst_52 [1, 2] : vector<1x4x4xf32> to vector<1xf32>
      %172 = vector.shape_cast %171 : vector<1xf32> to vector<1x1x1xf32>
      %173 = vector.extract %172[0, 0, 0] : f32 from vector<1x1x1xf32>
      %cst_53 = arith.constant 4.000000e+00 : f32
      %174 = arith.divf %173, %cst_53 : f32
      %cst_54 = arith.constant 0.000000e+00 : f32
      %175 = vector.broadcast %cst_54 : f32 to vector<1x128xf32>
      %176 = vector.broadcast %174 : f32 to vector<1x128xf32>
      %177 = arith.addf %175, %176 : vector<1x128xf32>
      %c0_55 = arith.constant 0 : index
      %c0_56 = arith.constant 0 : index
      %178 = vector.load %arg3[%c0_55, %c0_56] : memref<1x128xf32, #tpu.memory_space<vmem>>, vector<1x128xf32>
      tpu.vector_store %arg3[%c0_55, %c0_56], %177 {strides = array<i32>} : memref<1x128xf32, #tpu.memory_space<vmem>>, vector<1x128xf32>,
    } else {
    }
    return
  }
  func.func @transform_0(%arg0: i32) -> (i32, i32) {
    %c0_i32 = arith.constant 0 : i32
    %c0_i32_0 = arith.constant 0 : i32
    return %c0_i32, %arg0 : i32, i32
  }
  func.func @transform_1(%arg0: i32) -> (i32, i32) {
    %c0_i32 = arith.constant 0 : i32
    %c0_i32_0 = arith.constant 0 : i32
    return %c0_i32, %arg0 : i32, i32
  }
  func.func @transform_2(%arg0: i32) -> (i32, i32) {
    %c0_i32 = arith.constant 0 : i32
    %c0_i32_0 = arith.constant 0 : i32
    %c0_i32_1 = arith.constant 0 : i32
    return %c0_i32, %c0_i32_0 : i32, i32
  }
}

</mosaic_0001>

<bundles_post_ra>
// kernel: tpu_custom_call.1
= control target key start
LH: loop header
LB: loop body
LE: loop exit
PB: predicated region body
PF: predicated region fallthrough
CT: control target
= control target key end

     0   :  { %7 = vsyncpa [#allocation5], 0  ;;  %s1812_s0 = inlined_call_operand.hbm [shape: f32[2,1024], index: 0, kind: input, shape index: {}]   ;;  %s1813_s1 = inlined_call_operand.hbm [shape: f32[2,1024], index: 1, kind: input, shape index: {}]   ;;  %s1814_s2 = inlined_call_operand.hbm [shape: f32[1,128], index: 2, kind: output, shape index: {}]  }
   0x1   :  { %9 = vsyncpa [#allocation5 + $0x1], 0 }
   0x2   :  { %10 = vsyncpa [#allocation8], 0 }
   0x3   :  { %12 = vsyncpa [#allocation8 + $0x1], 0 }
   0x4   :  { %13 = vsyncpa [#allocation6], 0  ;;  %s1494_s9 = smov 0   ;;  %s1496_s10 = smov 0  }
   0x5   :  { %s1498_s11 = smov 0   ;;  %s1500_s12 = smov 0  }
   0x6 LB: > { %s1513_s13 = sadd.s32 4294967295, %s1468_s12   ;;  %s1516_s14 = sadd.s32 1, %s1468_s12   ;;  %s1468_s12 = sphi %s1500_s12, %s1822_s12   ;;  %s1464_s11 = sphi %s1498_s11, %s1821_s11   ;;  %s1460_s10 = sphi %s1496_s10, %s1820_s10   ;;  %s1456_s9 = sphi %s1494_s9, %s1819_s9  }
   0x7   : > { %s23_s15 = ssub.s32 %s1468_s12, %s1516_s14  ;;  %s26_s16 = sadd.s32 1, %s1464_s11 }
   0x8   : > { %p24_p0 = scmp.eq.s32.totalorder %s23_s15, 0  ;;  %p33_p1 = scmp.ne.s32.totalorder %s1464_s11, %s1460_s10 }
   0x9   : > { %p34_p2 = scmp.eq.s32.totalorder %s1468_s12, 0  ;;  %p39_p3 = scmp.ne.s32.totalorder %s1460_s10, %s1456_s9 }
   0xa   : > { %s1526_s17 = scalar_select %p24_p0, %s1464_s11, %s26_s16  }
   0xb   : > { %p1528_p4 = por %p34_p2, %p33_p1  ;;  %p40_p5 = scmp.eq.s32.totalorder %s1513_s13, 0 }
   0xc   : > { %p1264_p6 = scmp.lt.s32.totalorder %s1468_s12, 2  ;;  %s1539_s20 = sand.u32 1, %s1464_s11  }
   0xd   : > { %p1534_p7 = por %p40_p5, %p39_p3  ;;  %s1211_s21 = sshll.u32 %s1539_s20, 3 }
   0xe   : > { %s1231_s22 = sshll.u32 %s1468_s12, 3  ;;  %s114_s26 = scalar_lea.vmem [#allocation4], %s1211_s21 }
   0xf   : > { %s119_s25 = scalar_lea.hbm %s1812_s0, %s1231_s22  ;;  %s123_s27 = sshll.u32 %s114_s26, 4  ;;  %s124_s27 = int_to_ptr.vmem [resolvable:$true] %s123_s27 }
  0x10   : > { %s121_s28 = sshll.u32 %s119_s25, 4  ;;  %p1548_p8 = pnand %p1264_p6, %p1528_p4  ;;  %s122_s28 = int_to_ptr.hbm [resolvable:$true] %s121_s28 }
  0x11   : > { %p1217_p9 = scmp.ge.s32.totalorder %s1468_s12, 1  ;;  %p148_p10 = scmp.lt.s32.totalorder %s1468_s12, 3 }
  0x12   : > { %s111_s30 = scalar_lea.sflag [#allocation5], %s1539_s20  ;;  %s1338_s3 = sshra.s32 %s122_s28, 4  ;;  %s1339_s3 = int_to_ptr.hbm [resolvable:$true] %s1338_s3 }
  0x13   : > { %s1340_s4 = scalar_lea.hbm %s1339_s3, 8  ;;  %p1342_p12 = pneg %p1548_p8 }
  0x14   : > { %p1341_p11 = scmp.ne.s32.totalorder %s1339_s3, %s1340_s4  ;;  %s1345_s7 = scalar_lea.hbm %s1812_s0, 16 }
  0x15   : > { %p1346_p1 = scmp.lt.s32.totalorder %s1339_s3, %s1812_s0  ;;  %p1347_p2 = scmp.lt.s32.totalorder %s1345_s7, %s1340_s4 }
  0x16   : > { %p1343_p13 = pnand %p1342_p12, %p1341_p11 }
  0x17   : > { %p1348_p3 = por %p1347_p2, %p1346_p1 }
  0x18   : > { %p1344_p0 = pneg %p1343_p13 }
  0x1a   : > { %p1349_p4 = pnand %p1348_p3, %p1344_p0 }
  0x1c   : > { %1352 = shalt.err (!%p1349_p4)
}
  0x1d   : > { %1260 = dma.hbm_to_vmem [thread:$0]  (!%p1548_p8), %s122_s28, 128, %s124_s27, %s111_s30  }
  0x1e   : > { %p1572_p5 = pnand %p1217_p9, %p148_p10  ;;  %s139_s23 = scalar_lea.hbm %s1813_s1, %s1231_s22 }
  0x1f   : > { %s134_s24 = scalar_lea.vmem [#allocation7], %s1211_s21  ;;  %s141_s26 = sshll.u32 %s139_s23, 4  ;;  %s142_s26 = int_to_ptr.hbm [resolvable:$true] %s141_s26 }
  0x20   : > { %s143_s25 = sshll.u32 %s134_s24, 4  ;;  %s131_s3 = scalar_lea.sflag [#allocation8], %s1539_s20  ;;  %s144_s25 = int_to_ptr.vmem [resolvable:$true] %s143_s25 }
  0x21   : > { %s1368_s4 = sshra.s32 %s142_s26, 4  ;;  %s1375_s28 = scalar_lea.hbm %s1813_s1, 16  ;;  %s1369_s4 = int_to_ptr.hbm [resolvable:$true] %s1368_s4 }
  0x22   : > { %s1370_s5 = scalar_lea.hbm %s1369_s4, 8  ;;  %p1376_p11 = scmp.lt.s32.totalorder %s1369_s4, %s1813_s1 }
  0x23   : > { %p1371_p6 = scmp.ne.s32.totalorder %s1369_s4, %s1370_s5  ;;  %p1377_p13 = scmp.lt.s32.totalorder %s1375_s28, %s1370_s5 }
  0x25   : > { %p1373_p9 = pnand %p1371_p6, %p1342_p12  ;;  %p1378_p0 = por %p1377_p13, %p1376_p11 }
  0x27   : > { %p1374_p10 = pneg %p1373_p9 }
  0x29   : > { %p1379_p1 = pnand %p1378_p0, %p1374_p10 }
  0x2b   : > { %1382 = shalt.err (!%p1379_p1)
}
  0x2c   : > { %1263 = dma.hbm_to_vmem [thread:$0]  (!%p1548_p8), %s142_s26, 128, %s144_s25, %s131_s3  }
  0x2d   : > { %152 = sbr.rel (%p1572_p5) target bundleno = 881 (0x371), region = 28  ;;  %s154_s20 = sand.u32 (!%p1572_p5), 1, %s1460_s10  }
  0x2e   : > { %s1218_s21 = sshll.u32 (!%p1572_p5), %s154_s20, 3  ;;  %s155_s6 = scalar_lea.sflag (!%p1572_p5), [#allocation5], %s154_s20 }
  0x2f   : > { %s158_s7 = scalar_lea.vmem (!%p1572_p5), [#allocation4], %s1218_s21 }
  0x32   : > { %1443 = dma.done.wait (%p1534_p7), %s155_s6, 128  }
  0x33   : > { %1445 = vsyncadd (%p1534_p7), %s155_s6, 4294967168  ;;  %s165_s8 = scalar_lea.sflag [#allocation8], %s154_s20  ;;  %s168_s9 = scalar_lea.vmem [#allocation7], %s1218_s21 }
  0x34   : > { %1447 = dma.done.wait (%p1534_p7), %s165_s8, 128  }
  0x35   : > { %1449 = vsyncadd (%p1534_p7), %s165_s8, 4294967168  ;;  %p1220_p8 = scmp.ne.s32.totalorder %s1513_s13, 0 }
  0x37   : > { %195 = sbr.rel (%p1220_p8) target bundleno = 63 (0x3f), region = 40 }
  0x3c   : > { %vm196_vm0 = vcmask 27648   ;;  %v1470_v0 = vmov 0.0  }
  0x3d   : > { %197 = vst.msk [vmem:[#allocation2] sm:$0xf] %vm196_vm0, %v1470_v0 }
  0x3e   : > { %198 = vst.msk [vmem:[#allocation3] sm:$0xf] %vm196_vm0, %v1470_v0 }
  0x3f PF: > { %v199_v1 = vld [vmem:[%s158_s7] sm:$0xff]  ;;  %v200_v2 = vld [vmem:[%s168_s9] sm:$0xff]  ;;  %vm222_vm1 = vcmask 1041408   ;;  %vm829_vm2 = vcmask 1043456   ;;  %vm813_vm7 = vcmask 27648   ;;  %p1225_p7 = scmp.ne.s32.totalorder %s1513_s13, 1 }
  0x40   : > { %202 = vst [vmem:[#allocation1] ss:$4 sm:$0xff] %v199_v1 }
  0x47   : > { %v203_v3 = vld.sshfl [vmem:[#allocation1] sm:$0xff pattern:$0x73625140]  ;;  %v204_v4 = vld.sshfl [vmem:[#allocation1 + $0x8] sm:$0xff pattern:$0x73625140] }
  0x48   : > { %v205_v5 = vld.sshfl [vmem:[#allocation1 + $0x10] sm:$0xff pattern:$0x73625140]  ;;  %v206_v6 = vld.sshfl [vmem:[#allocation1 + $0x18] sm:$0xff pattern:$0x73625140] }
  0x49   : > { %213 = vst [vmem:[#allocation1 + $0x1] ss:$4 sm:$0xff] %v200_v2 }
  0x50   : > { %v214_v7 = vld.sshfl [vmem:[#allocation1] sm:$0xff pattern:$0x73625140]  ;;  %v215_v8 = vld.sshfl [vmem:[#allocation1 + $0x8] sm:$0xff pattern:$0x73625140] }
  0x51   : > { %v217_v9 = vld.sshfl [vmem:[#allocation1 + $0x18] sm:$0xff pattern:$0x73625140]  ;;  %v1603_v10 = vsel %vm222_vm1, %v203_v3, %v214_v7  ;;  %v1605_v11 = vsel %vm222_vm1, %v204_v4, %v215_v8  ;;  %v216_v12 = vld.sshfl [vmem:[#allocation1 + $0x10] sm:$0xff pattern:$0x73625140] }
  0x52   : > { %v1607_v13 = vsel %vm222_vm1, %v206_v6, %v217_v9  ;;  %v1610_v14 = vand.u32 4294901760, %v1603_v10  ;;  %v1613_v15 = vand.u32 4294901760, %v1605_v11  ;;  %v1615_v16 = vsel %vm222_vm1, %v205_v5, %v216_v12 }
  0x53   : > { %v1618_v17 = vand.u32 4294901760, %v1615_v16  ;;  %v1621_v18 = vand.u32 4294901760, %v1607_v13  ;;  %v817_v19 = vperm.slane %v1603_v10, 0  ;;  %v818_v20 = vperm.slane %v1605_v11, 0 }
  0x54   : > { %v246_v21 = vsub.f32 %v1603_v10, %v1610_v14  ;;  %244 = vmatpush.xpose.msra.mxu0 %v1610_v14  ;;  %320 = vmatpush.xpose.msra.mxu3 %v1610_v14  ;;  %v1631_v22 = vsub.f32 %v1605_v11, %v1613_v15  ;;  %v819_v23 = vperm.slane %v1615_v16, 0  ;;  %v820_v30 = vperm.slane %v1607_v13, 0 }
  0x55   : > { %v1636_v24 = vsub.f32 %v1615_v16, %v1618_v17  ;;  %v1640_v25 = vsub.f32 %v1607_v13, %v1621_v18  ;;  %v821_v26 = vsub.f32 %v1603_v10, %v817_v19  ;;  %v822_v27 = vsub.f32 %v1605_v11, %v818_v20 }
  0x56   : > { %297 = vmatpush.xpose.msra.mxu2 %v246_v21  ;;  %v247_v28 = vand.u32 4294901760, %v246_v21  ;;  %v1645_v29 = vand.u32 4294901760, %v1631_v22  ;;  %v823_v31 = vsub.f32 %v1615_v16, %v819_v23  ;;  %v824_v38 = vsub.f32 %v1607_v13, %v820_v30 }
  0x57   : > { %v1651_v32 = vand.u32 4294901760, %v1636_v24  ;;  %v1654_v33 = vand.u32 4294901760, %v1640_v25  ;;  %v825_v34 = vand.u32 2147483647, %v821_v26  ;;  %v826_v35 = vand.u32 2147483647, %v822_v27 }
  0x58   : > { %v248_v36 = vsub.f32 %v246_v21, %v247_v28  ;;  %324 = vmatmul.f32.vlgmr.msra.gmra.mxu3 %v247_v28  ;;  %346 = vmatpush.xpose.msrb.mxu0 %v247_v28  ;;  %v394_v37 = vsub.f32 %v1631_v22, %v1645_v29  ;;  %v827_v39 = vand.u32 2147483647, %v823_v31  ;;  %v870_v42 = vperm.slane %v1603_v10, 2 }
  0x59   : > { %300 = vmatmul.f32.vlgmr.msra.gmra.mxu2 %v246_v21  ;;  %v540_v40 = vsub.f32 %v1636_v24, %v1651_v32  ;;  %v686_v41 = vsub.f32 %v1640_v25, %v1654_v33  ;;  %v828_v45 = vand.u32 2147483647, %v824_v38  ;;  %v830_v46 = vsel %vm829_vm2, %v825_v34, 0.0 }
  0x5a   : > { %390 = vmatpush.xpose.msrb.mxu2 %v1613_v15  ;;  %v249_v43 = vand.u32 4294901760, %v248_v36  ;;  %v395_v44 = vand.u32 4294901760, %v394_v37  ;;  %v831_v49 = vsel %vm829_vm2, %v826_v35, 0.0  ;;  %v833_v50 = vsel %vm829_vm2, %v827_v39, 0.0 }
  0x5b   : > { %v1666_v47 = vand.u32 4294901760, %v540_v40  ;;  %v1668_v48 = vand.u32 4294901760, %v686_v41  ;;  %v832_v51 = vadd.f32 %v831_v49, %v830_v46  ;;  %v835_v52 = vsel %vm829_vm2, %v828_v45, 0.0 }
  0x5c   : > { %274 = vmatpush.xpose.msra.mxu1 %v249_v43  ;;  %250 = vmatmul.f32.vlgmr.msra.gmra.mxu0 %v249_v43  ;;  %v871_v53 = vperm.slane %v1605_v11, 2  ;;  %v872_v54 = vperm.slane %v1615_v16, 2  ;;  %v873_v55 = vperm.slane %v1607_v13, 2  ;;  %v874_v56 = vsub.f32 %v1603_v10, %v870_v42 }
  0x5d   : > { %420 = vmatpush.xpose.msrb.mxu3 %v395_v44  ;;  %v844_v57 = vperm.slane %v1603_v10, 1  ;;  %v845_v58 = vperm.slane %v1605_v11, 1  ;;  %443 = vmatpush.xpose.msra.mxu0 %v1631_v22  ;;  %v834_v59 = vadd.f32 %v833_v50, %v832_v51  ;;  %v846_v62 = vperm.slane %v1615_v16, 1 }
  0x5e   : > { %492 = vmatpush.xpose.msra.mxu2 %v1645_v29  ;;  %v875_v60 = vsub.f32 %v1605_v11, %v871_v53  ;;  %v876_v61 = vsub.f32 %v1615_v16, %v872_v54  ;;  %v877_v63 = vsub.f32 %v1607_v13, %v873_v55  ;;  %v878_v0 = vand.u32 2147483647, %v874_v56 }
  0x5f   : > { %276 = vmatmul.f32.vlgmr.msra.gmra.mxu1 %v1610_v14  ;;  %v847_v1 = vperm.slane %v1607_v13, 1  ;;  %v848_v2 = vsub.f32 %v1603_v10, %v844_v57  ;;  %v836_v3 = vadd.f32 %v835_v52, %v834_v59  ;;  %v849_v6 = vsub.f32 %v1605_v11, %v845_v58 }
  0x60   : > { %368 = vmatpush.xpose.msrb.mxu1 %v1610_v14  ;;  %422 = vmatmul.f32.vlgmr.msrb.gmra.mxu3 %v1613_v15  ;;  %v879_v4 = vand.u32 2147483647, %v875_v60  ;;  %v880_v5 = vand.u32 2147483647, %v876_v61  ;;  %v881_v7 = vand.u32 2147483647, %v877_v63  ;;  %v850_v9 = vsub.f32 %v1615_v16, %v846_v62 }
  0x61   : > { %514 = vmatpush.xpose.msra.mxu3 %v1613_v15  ;;  %396 = vmatmul.f32.vlgmr.msrb.gmra.mxu2 %v395_v44  ;;  %v882_v8 = vsel %vm829_vm2, %v878_v0, 0.0  ;;  %v851_v12 = vsub.f32 %v1607_v13, %v847_v1  ;;  %v852_v21 = vand.u32 2147483647, %v848_v2  ;;  %v853_v23 = vand.u32 2147483647, %v849_v6 }
  0x62   : > { %589 = vmatpush.xpose.msrb.mxu2 %v1636_v24  ;;  %837 = vadd.xlane.f32.xlu0 %v836_v3  ;;  %v883_v19 = vsel %vm829_vm2, %v879_v4, 0.0  ;;  %v885_v20 = vsel %vm829_vm2, %v880_v5, 0.0  ;;  %v887_v27 = vsel %vm829_vm2, %v881_v7, 0.0  ;;  %v854_v28 = vand.u32 2147483647, %v850_v9 }
  0x63   : > { %v884_v26 = vadd.f32 %v883_v19, %v882_v8  ;;  %v855_v30 = vand.u32 2147483647, %v851_v12  ;;  %v856_v31 = vsel %vm829_vm2, %v852_v21, 0.0  ;;  %v857_v34 = vsel %vm829_vm2, %v853_v23, 0.0  ;;  %v922_v23 = vld [vmem:[#allocation3] sm:$0xf] }
  0x64   : > { %466 = vmatpush.xpose.msra.mxu1 %v1613_v15  ;;  %348 = vmatmul.f32.vlgmr.msrb.gmra.mxu0 %v1610_v14  ;;  %v896_v35 = vperm.slane %v1603_v10, 3  ;;  %v897_v36 = vperm.slane %v1605_v11, 3  ;;  %v858_v38 = vadd.f32 %v857_v34, %v856_v31  ;;  %v859_v39 = vsel %vm829_vm2, %v854_v28, 0.0 }
  0x65   : > { %612 = vmatpush.xpose.msrb.mxu3 %v1618_v17  ;;  %536 = vmatpush.xpose.msrb.mxu0 %v1618_v17  ;;  %v886_v37 = vadd.f32 %v885_v20, %v884_v26  ;;  %v861_v40 = vsel %vm829_vm2, %v855_v30, 0.0  ;;  %v898_v41 = vperm.slane %v1615_v16, 3  ;;  %v899_v42 = vperm.slane %v1607_v13, 3 }
  0x66   : > { %v900_v43 = vsub.f32 %v1603_v10, %v896_v35  ;;  %v901_v44 = vsub.f32 %v1605_v11, %v897_v36  ;;  %v860_v46 = vadd.f32 %v859_v39, %v858_v38 }
  0x67   : > { %370 = vmatmul.f32.vlgmr.msrb.gmra.mxu1 %v1610_v14  ;;  %v888_v45 = vadd.f32 %v887_v27, %v886_v37  ;;  %v902_v49 = vsub.f32 %v1615_v16, %v898_v41  ;;  %v903_v50 = vsub.f32 %v1607_v13, %v899_v42 }
  0x68   : > { %516 = vmatmul.f32.vlgmr.msra.gmra.mxu3 %v1613_v15  ;;  %566 = vmatpush.xpose.msrb.mxu1 %v1666_v47  ;;  %v904_v51 = vand.u32 2147483647, %v900_v43  ;;  %v905_v52 = vand.u32 2147483647, %v901_v44  ;;  %v862_v10 = vadd.f32 %v861_v40, %v860_v46 }
  0x69   : > { %494 = vmatmul.f32.vlgmr.msra.gmra.mxu2 %v1613_v15  ;;  %712 = vmatpush.xpose.msra.mxu3 %v1668_v48  ;;  %v906_v11 = vand.u32 2147483647, %v902_v49  ;;  %v907_v14 = vand.u32 2147483647, %v903_v50 }
  0x6a   : > { %682 = vmatpush.xpose.msra.mxu2 %v1621_v18  ;;  %889 = vadd.xlane.f32.xlu1 %v888_v45  ;;  %v908_v53 = vsel %vm829_vm2, %v904_v51, 0.0  ;;  %v909_v54 = vsel %vm829_vm2, %v905_v52, 0.0 }
  0x6b   : > { %863 = vadd.xlane.f32.xlu0 %v862_v10  ;;  %v910_v16 = vadd.f32 %v909_v54, %v908_v53  ;;  %v911_v13 = vsel %vm829_vm2, %v906_v11, 0.0  ;;  %v913_v15 = vsel %vm829_vm2, %v907_v14, 0.0 }
  0x6c   : > { %446 = vmatmul.f32.vlgmr.msra.gmra.mxu0 %v1631_v22  ;;  %v815_v22 = vlaneseq }
  0x6d   : > { %638 = vmatpush.xpose.msra.mxu0 %v1651_v32  ;;  %v912_v55 = vadd.f32 %v911_v13, %v910_v16 }
  0x6f   : > { %470 = vmatmul.f32.vlgmr.msra.gmra.mxu1 %v1645_v29  ;;  %v914_v56 = vadd.f32 %v913_v15, %v912_v55 }
  0x70   : > { %616 = vmatmul.f32.vlgmr.msrb.gmra.mxu3 %v1651_v32  ;;  %660 = vmatpush.xpose.msra.mxu1 %v1618_v17 }
  0x71   : > { %592 = vmatmul.f32.vlgmr.msrb.gmra.mxu2 %v1636_v24  ;;  %806 = vmatpush.xpose.msrb.mxu3 %v1621_v18  ;;  %v1745_v24 = vand.u32 127, %v815_v22 }
  0x72   : > { %784 = vmatpush.xpose.msrb.mxu2 %v1654_v33  ;;  %915 = vadd.xlane.f32.xlu1 %v914_v56 }
  0x73   : > { %vm839_vm3 = vcmp.eq.s32.totalorder %v1745_v24, 0  ;;  %vm865_vm4 = vcmp.eq.s32.totalorder %v1745_v24, 1  ;;  %vm891_vm5 = vcmp.eq.s32.totalorder %v1745_v24, 2  ;;  %vm917_vm6 = vcmp.eq.s32.totalorder %v1745_v24, 3 }
  0x74   : > { %542 = vmatmul.f32.vlgmr.msrb.gmra.mxu0 %v1666_v47  ;;  %v1471_v47 = vmov 0.0  }
  0x75   : > { %735 = vmatpush.xpose.msrb.mxu0 %v1640_v25  ;;  %v1223_v59 = vsel %vm891_vm5, 1.0, %v1471_v47  ;;  %v1224_v6 = vsel %vm917_vm6, 1.0, %v1471_v47 }
  0x77   : > { %568 = vmatmul.f32.vlgmr.msrb.gmra.mxu1 %v1618_v17 }
  0x78   : > { %714 = vmatmul.f32.vlgmr.msra.gmra.mxu3 %v1621_v18  ;;  %758 = vmatpush.xpose.msrb.mxu1 %v1621_v18 }
  0x79   : > { %688 = vmatmul.f32.vlgmr.msra.gmra.mxu2 %v1668_v48 }
  0x7c   : > { %640 = vmatmul.f32.vlgmr.msra.gmra.mxu0 %v1618_v17 }
  0x7f   : > { %662 = vmatmul.f32.vlgmr.msra.gmra.mxu1 %v1618_v17  ;;  %v1221_v17 = vsel %vm839_vm3, 1.0, %v1471_v47 }
  0x80   : > { %808 = vmatmul.f32.vlgmr.msrb.gmra.mxu3 %v1621_v18 }
  0x81   : > { %786 = vmatmul.f32.vlgmr.msrb.gmra.mxu2 %v1621_v18 }
  0x84   : > { %738 = vmatmul.f32.vlgmr.msrb.gmra.mxu0 %v1640_v25  ;;  %v1222_v25 = vsel %vm865_vm4, 1.0, %v1471_v47  ;;  %v227_v47 = vld [vmem:[#allocation2] sm:$0xf] }
  0x87   : > { %762 = vmatmul.f32.vlgmr.msrb.gmra.mxu1 %v1654_v33 }
  0xd5   : > { %v838_v29 = vpop.xlane.xlu0 %837 }
  0xd6   : > { %v842_v33 = vmul.f32 %v1221_v17, %v838_v29 }
  0xd9   : > { %v251_v32 = vpop.f32.mrf.mxu0 }
  0xdb   : > { %v325_v48 = vpop.f32.mrf.mxu3 }
  0xdc   : > { %v277_v18 = vpop.f32.mrf.mxu1  ;;  %v301_v57 = vpop.f32.mrf.mxu2 }
  0xdd   : > { %v278_v58 = vadd.f32 %v277_v18, %v251_v32  ;;  %v890_v60 = vpop.xlane.xlu1 %889 }
  0xde   : > { %v864_v61 = vpop.xlane.xlu0 %863  ;;  %v894_v0 = vmul.f32 %v1223_v59, %v890_v60 }
  0xdf   : > { %v302_v62 = vadd.f32 %v301_v57, %v278_v58  ;;  %v868_v63 = vmul.f32 %v1222_v25, %v864_v61 }
  0xe1   : > { %v326_v1 = vadd.f32 %v325_v48, %v302_v62  ;;  %v349_v2 = vpop.f32.mrf.mxu0  ;;  %v869_v3 = vadd.f32 %v868_v63, %v842_v33 }
  0xe3   : > { %v350_v4 = vadd.f32 %v349_v2, %v326_v1  ;;  %v423_v5 = vpop.f32.mrf.mxu3  ;;  %v895_v9 = vadd.f32 %v894_v0, %v869_v3 }
  0xe4   : > { %v371_v7 = vpop.f32.mrf.mxu1  ;;  %v397_v8 = vpop.f32.mrf.mxu2 }
  0xe5   : > { %v372_v12 = vadd.f32 %v371_v7, %v350_v4  ;;  %v916_v19 = vpop.xlane.xlu1 %915 }
  0xe6   : > { %v920_v20 = vmul.f32 %v1224_v6, %v916_v19 }
  0xe7   : > { %v398_v21 = vadd.f32 %v397_v8, %v372_v12 }
  0xe8   : > { %v921_v26 = vadd.f32 %v920_v20, %v895_v9 }
  0xe9   : > { %v424_v27 = vadd.f32 %v423_v5, %v398_v21  ;;  %v447_v28 = vpop.f32.mrf.mxu0 }
  0xea   : > { %v923_v30 = vadd.f32 %v922_v23, %v921_v26 }
  0xeb   : > { %v448_v31 = vadd.f32 %v447_v28, %v424_v27  ;;  %v517_v34 = vpop.f32.mrf.mxu3 }
  0xec   : > { %v471_v35 = vpop.f32.mrf.mxu1  ;;  %v495_v36 = vpop.f32.mrf.mxu2  ;;  %924 = vst.msk [vmem:[#allocation3] sm:$0xf] %vm813_vm7, %v923_v30 }
  0xed   : > { %v472_v37 = vadd.f32 %v471_v35, %v448_v31 }
  0xef   : > { %v496_v38 = vadd.f32 %v495_v36, %v472_v37 }
  0xf1   : > { %v518_v39 = vadd.f32 %v517_v34, %v496_v38  ;;  %v543_v40 = vpop.f32.mrf.mxu0 }
  0xf3   : > { %v544_v41 = vadd.f32 %v543_v40, %v518_v39  ;;  %v617_v42 = vpop.f32.mrf.mxu3 }
  0xf4   : > { %v569_v43 = vpop.f32.mrf.mxu1  ;;  %v593_v44 = vpop.f32.mrf.mxu2 }
  0xf5   : > { %v570_v45 = vadd.f32 %v569_v43, %v544_v41 }
  0xf7   : > { %v594_v46 = vadd.f32 %v593_v44, %v570_v45 }
  0xf9   : > { %v618_v49 = vadd.f32 %v617_v42, %v594_v46  ;;  %v641_v50 = vpop.f32.mrf.mxu0 }
  0xfb   : > { %v642_v51 = vadd.f32 %v641_v50, %v618_v49  ;;  %v715_v52 = vpop.f32.mrf.mxu3 }
  0xfc   : > { %v663_v10 = vpop.f32.mrf.mxu1  ;;  %v689_v11 = vpop.f32.mrf.mxu2 }
  0xfd   : > { %v664_v14 = vadd.f32 %v663_v10, %v642_v51 }
  0xff   : > { %v690_v53 = vadd.f32 %v689_v11, %v664_v14 }
 0x101   : > { %v716_v54 = vadd.f32 %v715_v52, %v690_v53  ;;  %v739_v16 = vpop.f32.mrf.mxu0 }
 0x103   : > { %v740_v13 = vadd.f32 %v739_v16, %v716_v54  ;;  %v809_v29 = vpop.f32.mrf.mxu3 }
 0x104   : > { %v763_v15 = vpop.f32.mrf.mxu1  ;;  %v787_v55 = vpop.f32.mrf.mxu2 }
 0x105   : > { %v764_v56 = vadd.f32 %v763_v15, %v740_v13 }
 0x107   : > { %v788_v32 = vadd.f32 %v787_v55, %v764_v56 }
 0x109   : > { %v810_v17 = vadd.f32 %v809_v29, %v788_v32  ;;  %928 = sbr.rel (%p1225_p7) target bundleno = 876 (0x36c), region = 44 }
 0x10b   : > { %v812_v48 = vadd.f32 %v810_v17, %v227_v47 }
 0x10d   : > { %814 = vst.msk [vmem:[#allocation2] sm:$0xf] %vm813_vm7, %v812_v48 }
 0x10e   : > { %v1755_v18 = vshrl.u32 %v815_v22, 7  ;;  %v1472_v25 = vmov 0.0   ;;  %v1760_v60 = vld [vmem:[#allocation3] sm:$0xf]  ;;  %v1473_v9 = vmov 12.0   ;;  %v1474_v12 = vmov 100.0  }
 0x10f   : > { %v978_v61 = vsel %vm813_vm7, %v1760_v60, 0.0  ;;  %1308 = vrcp.f32 %v1473_v9  ;;  %vm1099_vm4 = vcmp.lt.s32.totalorder %v1745_v24, 2  ;;  %vm1475_vm6 = vmmov 1  }
 0x110   : > { %vm933_vm8 = vcmp.eq.s32.totalorder %v1755_v18, %v1745_v24  ;;  %979 = vadd.xlane.f32.xlu1 %v978_v61  ;;  %1310 = vrcp.f32 %v1474_v12  ;;  %vm1098_vm3 = vcmp.lt.s32.totalorder %v1755_v18, 2 }
 0x111   : > { %v1226_v58 = vsel %vm933_vm8, 1.0, %v1472_v25  ;;  %vm1100_vm5 = vmxor %vm1098_vm3, %vm1099_vm4 }
 0x112   : > { %vm1101_vm8 = vmxor %vm1100_vm5, %vm1475_vm6 }
 0x114   : > { %v929_v57 = vld [vmem:[#allocation2] sm:$0xf] }
 0x115   : > { %v936_v33 = vmul.f32 %v1226_v58, %v929_v57  ;;  %v947_v3 = vmul.f32 2.0, %v929_v57  ;;  %v1309_v20 = vpop.eup %1308 }
 0x116   : > { %v1311_v21 = vpop.eup %1310  ;;  %v961_v26 = vmul.f32 12.0, %v1309_v20  ;;  %vm965_vm9 = vweird.f32 %v1309_v20 }
 0x117   : > { %v937_v59 = vsel %vm813_vm7, %v936_v33, 0.0  ;;  %v970_v27 = vmul.f32 100.0, %v1311_v21  ;;  %vm974_vm10 = vweird.f32 %v1311_v21 }
 0x118   : > { %938 = vadd.xlane.f32.xlu0 %v937_v59  ;;  %v940_v62 = vrot.slane %v937_v59, 4  ;;  %v962_v30 = vsub.f32 1.0, %v961_v26 }
 0x119   : > { %v971_v34 = vsub.f32 1.0, %v970_v27 }
 0x11a   : > { %v941_v63 = vadd.f32 %v940_v62, %v937_v59  ;;  %v963_v38 = vmul.f32 %v1309_v20, %v962_v30 }
 0x11b   : > { %v972_v39 = vmul.f32 %v1311_v21, %v971_v34 }
 0x11c   : > { %v942_v22 = vrot.slane %v941_v63, 2  ;;  %v964_v43 = vadd.f32 %v1309_v20, %v963_v38 }
 0x11d   : > { %v973_v44 = vadd.f32 %v1311_v21, %v972_v39 }
 0x11e   : > { %v943_v0 = vadd.f32 %v942_v22, %v941_v63  ;;  %v966_v50 = vsel %vm965_vm9, %v1309_v20, %v964_v43 }
 0x11f   : > { %v975_v51 = vsel %vm974_vm10, %v1311_v21, %v973_v44 }
 0x120   : > { %v944_v1 = vrot.slane %v943_v0, 1 }
 0x122   : > { %v945_v2 = vadd.f32 %v944_v1, %v943_v0 }
 0x183   : > { %v980_v19 = vpop.xlane.xlu1 %979 }
 0x184   : > { %v981_v23 = vrot.slane %v980_v19, 4 }
 0x186   : > { %v982_v28 = vadd.f32 %v981_v23, %v980_v19 }
 0x188   : > { %v983_v36 = vrot.slane %v982_v28, 2 }
 0x18a   : > { %v984_v41 = vadd.f32 %v983_v36, %v982_v28 }
 0x18b   : > { %v939_v4 = vpop.xlane.xlu0 %938 }
 0x18c   : > { %v946_v5 = vadd.f32 %v945_v2, %v939_v4  ;;  %v985_v46 = vrot.slane %v984_v41, 1 }
 0x18e   : > { %v948_v6 = vsub.f32 %v946_v5, %v947_v3  ;;  %v986_v52 = vadd.f32 %v985_v46, %v984_v41 }
 0x190   : > { %v1764_v7 = vmax.f32 %v948_v6, 0.0 }
 0x192   : > { %v950_v8 = vsel %vm813_vm7, %v1764_v7, 0.0 }
 0x193   : > { %951 = vadd.xlane.f32.xlu0 %v950_v8 }
 0x206   : > { %v952_v31 = vpop.xlane.xlu0 %951 }
 0x207   : > { %v953_v35 = vrot.slane %v952_v31, 4 }
 0x209   : > { %v954_v37 = vadd.f32 %v953_v35, %v952_v31 }
 0x20b   : > { %v955_v40 = vrot.slane %v954_v37, 2 }
 0x20d   : > { %v956_v42 = vadd.f32 %v955_v40, %v954_v37 }
 0x20f   : > { %v957_v45 = vrot.slane %v956_v42, 1 }
 0x211   : > { %v958_v49 = vadd.f32 %v957_v45, %v956_v42 }
 0x213   : > { %1233 = vpush %v958_v49 }
 0x214   : > { %1235 = vpush %v966_v50 }
 0x215   : > { %1237 = vpush %v975_v51 }
 0x216   : > { %1239 = vpush %v986_v52 }
 0x244   : > { %s1234_s19 = spop %1233 }
 0x245   : > { %s1236_s29 = spop %1235 }
 0x246   : > { %s968_s15 = smul.f32 %s1236_s29, %s1234_s19  ;;  %s1238_s16 = spop %1237 }
 0x247   : > { %s1240_s18 = spop %1239 }
 0x248   : > { %s977_s23 = smul.f32 %s1238_s16, %s968_s15 }
 0x249   : > { %s996_s24 = smul.f32 %s1240_s18, %s1236_s29 }
 0x24a   : > { %v1006_v10 = vstv %s977_s23 }
 0x24b   : > { %1312 = vrcp.f32 %v1006_v10  ;;  %s1005_s25 = smul.f32 %s1238_s16, %s996_s24  ;;  %v1018_v15 = vand.u32 2147483648, %v1006_v10  ;;  %v1016_v56 = vand.u32 2147483647, %v1006_v10  ;;  %vm1012_vm12 = vweird.f32 %v1006_v10 }
 0x24d   : > { %v1023_v11 = vstv %s1005_s25  ;;  %v1019_v17 = vor.u32 1.1754944e-38, %v1018_v15  ;;  %vm1017_vm15 = vcmp.eq.f32.partialorder %v1016_v56, 8.507059e+37 }
 0x24e   : > { %1314 = vrcp.f32 %v1023_v11  ;;  %v1035_v47 = vand.u32 2147483648, %v1023_v11  ;;  %v1033_v57 = vand.u32 2147483647, %v1023_v11  ;;  %vm1029_vm0 = vweird.f32 %v1023_v11 }
 0x250   : > { %v1036_v59 = vor.u32 1.1754944e-38, %v1035_v47  ;;  %vm1034_vm2 = vcmp.eq.f32.partialorder %v1033_v57, 8.507059e+37 }
 0x251   : > { %v1313_v14 = vpop.eup %1312 }
 0x252   : > { %v1008_v53 = vmul.f32 %v1313_v14, %v1006_v10  ;;  %vm1013_vm11 = vweird.f32 %v1313_v14 }
 0x253   : > { %vm1014_vm13 = vmor %vm1012_vm12, %vm1013_vm11 }
 0x254   : > { %v1315_v54 = vpop.eup %1314  ;;  %v1009_v16 = vsub.f32 1.0, %v1008_v53 }
 0x255   : > { %v1025_v13 = vmul.f32 %v1315_v54, %v1023_v11  ;;  %vm1030_vm14 = vweird.f32 %v1315_v54 }
 0x256   : > { %v1010_v55 = vmul.f32 %v1313_v14, %v1009_v16  ;;  %vm1031_vm1 = vmor %vm1029_vm0, %vm1030_vm14 }
 0x257   : > { %v1026_v29 = vsub.f32 1.0, %v1025_v13 }
 0x258   : > { %v1011_v32 = vadd.f32 %v1313_v14, %v1010_v55  ;;  %v1476_v55 = vmov -1.0  }
 0x259   : > { %v1027_v48 = vmul.f32 %v1315_v54, %v1026_v29  ;;  %v1102_v56 = vsel %vm1101_vm8, 1.0, %v1476_v55 }
 0x25a   : > { %v1015_v25 = vsel %vm1014_vm13, %v1313_v14, %v1011_v32  ;;  %v1477_v32 = vmov 4.0  }
 0x25b   : > { %v1020_v58 = vsel %vm1017_vm15, %v1019_v17, %v1015_v25  ;;  %v1028_v33 = vadd.f32 %v1315_v54, %v1027_v48 }
 0x25c   : > { %1241 = vpush %v1020_v58 }
 0x25d   : > { %v1032_v61 = vsel %vm1031_vm1, %v1315_v54, %v1028_v33 }
 0x25e   : > { %v1037_v62 = vsel %vm1034_vm2, %v1036_v59, %v1032_v61 }
 0x25f   : > { %1243 = vpush %v1037_v62 }
 0x28d   : > { %s1242_s26 = spop %1241 }
 0x28e   : > { %s1768_s3 = smul.f32 -1.0, %s1242_s26 }
 0x290   : > { %v1040_v63 = vstv %s1768_s3  ;;  %s1050_s4 = smul.f32 0.1, %s1768_s3  ;;  %s1244_s12 = spop %1243 }
 0x291   : > { %v1041_v22 = vmul.f32 %v1040_v63, %v1764_v7  ;;  %s1062_s5 = smul.f32 0.01, %s1768_s3 }
 0x292   : > { %v1051_v0 = vstv %s1050_s4  ;;  %s1775_s27 = smul.f32 -1.0, %s1244_s12 }
 0x293   : > { %v1052_v1 = vmul.f32 %v1051_v0, %v1764_v7  ;;  %v1042_v2 = vmul.f32 1.442695, %v1041_v22  ;;  %v1063_v3 = vstv %s1062_s5  ;;  %s1074_s28 = smul.f32 0.001, %s1768_s3 }
 0x294   : > { %v1045_v5 = vstv %s1775_s27  ;;  %s1056_s30 = smul.f32 0.1, %s1775_s27  ;;  %v1064_v8 = vmul.f32 %v1063_v3, %v1764_v7 }
 0x295   : > { %v1053_v4 = vmul.f32 1.442695, %v1052_v1  ;;  %v1046_v6 = vmul.f32 %v1045_v5, %v1760_v60  ;;  %s1068_s22 = smul.f32 0.01, %s1775_s27  ;;  %1316 = vpow2.f32 %v1042_v2  ;;  %v1075_v21 = vstv %s1074_s28 }
 0x296   : > { %v1057_v9 = vstv %s1056_s30  ;;  %s1080_s20 = smul.f32 0.001, %s1775_s27  ;;  %v1065_v28 = vmul.f32 1.442695, %v1064_v8  ;;  %v1076_v30 = vmul.f32 %v1075_v21, %v1764_v7 }
 0x297   : > { %v1047_v12 = vmul.f32 1.442695, %v1046_v6  ;;  %v1058_v19 = vmul.f32 %v1057_v9, %v1760_v60  ;;  %v1069_v20 = vstv %s1068_s22  ;;  %1318 = vpow2.f32 %v1053_v4  ;;  %s1086_s21 = smul.f32 0.0001, %s1768_s3 }
 0x298   : > { %v1070_v26 = vmul.f32 %v1069_v20, %v1760_v60  ;;  %v1081_v27 = vstv %s1080_s20  ;;  %s1092_s6 = smul.f32 0.0001, %s1775_s27  ;;  %v1077_v40 = vmul.f32 1.442695, %v1076_v30 }
 0x299   : > { %1320 = vpow2.f32 %v1047_v12  ;;  %v1059_v23 = vmul.f32 1.442695, %v1058_v19  ;;  %v1087_v31 = vstv %s1086_s21  ;;  %v1082_v36 = vmul.f32 %v1081_v27, %v1760_v60 }
 0x29a   : > { %v1071_v35 = vmul.f32 1.442695, %v1070_v26  ;;  %v1093_v38 = vstv %s1092_s6  ;;  %v1088_v41 = vmul.f32 %v1087_v31, %v1764_v7 }
 0x29b   : > { %v1317_v34 = vpop.eup %1316  ;;  %1322 = vpow2.f32 %v1059_v23  ;;  %v1083_v43 = vmul.f32 1.442695, %v1082_v36  ;;  %v1094_v44 = vmul.f32 %v1093_v38, %v1760_v60 }
 0x29c   : > { %1324 = vpow2.f32 %v1065_v28  ;;  %v1089_v49 = vmul.f32 1.442695, %v1088_v41 }
 0x29d   : > { %v1319_v37 = vpop.eup %1318  ;;  %1326 = vpow2.f32 %v1071_v35  ;;  %v1095_v52 = vmul.f32 1.442695, %v1094_v44 }
 0x29e   : > { %1328 = vpow2.f32 %v1077_v40 }
 0x29f   : > { %v1321_v39 = vpop.eup %1320  ;;  %1330 = vpow2.f32 %v1083_v43 }
 0x2a0   : > { %v1049_v42 = vadd.f32 %v1321_v39, %v1317_v34  ;;  %1332 = vpow2.f32 %v1089_v49 }
 0x2a1   : > { %v1323_v46 = vpop.eup %1322  ;;  %1334 = vpow2.f32 %v1095_v52 }
 0x2a2   : > { %v1055_v45 = vadd.f32 %v1319_v37, %v1049_v42  ;;  %v1325_v51 = vpop.eup %1324  ;;  %1336 = vrcp.f32 %v1477_v32 }
 0x2a3   : > { %v1327_v11 = vpop.eup %1326 }
 0x2a4   : > { %v1061_v50 = vadd.f32 %v1323_v46, %v1055_v45  ;;  %v1329_v14 = vpop.eup %1328 }
 0x2a5   : > { %v1331_v53 = vpop.eup %1330 }
 0x2a6   : > { %v1067_v10 = vadd.f32 %v1325_v51, %v1061_v50  ;;  %v1333_v16 = vpop.eup %1332 }
 0x2a7   : > { %v1335_v15 = vpop.eup %1334 }
 0x2a8   : > { %v1073_v7 = vadd.f32 %v1327_v11, %v1067_v10  ;;  %v1337_v47 = vpop.eup %1336 }
 0x2a9   : > { %v1115_v17 = vmul.f32 4.0, %v1337_v47  ;;  %vm1119_vm9 = vweird.f32 %v1337_v47 }
 0x2aa   : > { %v1079_v60 = vadd.f32 %v1329_v14, %v1073_v7 }
 0x2ab   : > { %v1116_v48 = vsub.f32 1.0, %v1115_v17 }
 0x2ac   : > { %v1085_v54 = vadd.f32 %v1331_v53, %v1079_v60 }
 0x2ad   : > { %v1117_v33 = vmul.f32 %v1337_v47, %v1116_v48 }
 0x2ae   : > { %v1091_v13 = vadd.f32 %v1333_v16, %v1085_v54 }
 0x2af   : > { %v1118_v62 = vadd.f32 %v1337_v47, %v1117_v33 }
 0x2b0   : > { %v1097_v29 = vadd.f32 %v1335_v15, %v1091_v13 }
 0x2b1   : > { %v1120_v0 = vsel %vm1119_vm9, %v1337_v47, %v1118_v62 }
 0x2b2   : > { %v1103_v18 = vmul.f32 %v1102_v56, %v1097_v29 }
 0x2b4   : > { %v1104_v24 = vsel %vm813_vm7, %v1103_v18, 0.0 }
 0x2b5   : > { %1105 = vadd.xlane.f32.xlu1 %v1104_v24 }
 0x328   : > { %v1106_v57 = vpop.xlane.xlu1 %1105 }
 0x329   : > { %v1107_v25 = vrot.slane %v1106_v57, 4 }
 0x32b   : > { %v1108_v58 = vadd.f32 %v1107_v25, %v1106_v57 }
 0x32d   : > { %v1109_v59 = vrot.slane %v1108_v58, 2 }
 0x32f   : > { %v1110_v61 = vadd.f32 %v1109_v59, %v1108_v58 }
 0x331   : > { %v1111_v63 = vrot.slane %v1110_v61, 1 }
 0x333   : > { %v1112_v22 = vadd.f32 %v1111_v63, %v1110_v61 }
 0x335   : > { %1245 = vpush %v1112_v22 }
 0x336   : > { %1247 = vpush %v1120_v0 }
 0x366   : > { %s1246_s7 = spop %1245 }
 0x367   : > { %s1248_s8 = spop %1247 }
 0x368   : > { %s1122_s9 = smul.f32 %s1248_s8, %s1246_s7 }
 0x36a   : > { %v1123_v1 = vstv %s1122_s9 }
 0x36b   : > { %1125 = vst [vmem:[#allocation9] sm:$0x1] %v1123_v1 }
 0x36c PF: > { %p1265_p12 = scmp.eq.s32.totalorder %s1513_s13, 1  ;;  %s1478_s19 = smov [#allocation9]  }
 0x36d   : > { %s1132_s29 = sshll.u32 %s1478_s19, 4  ;;  %s1134_s18 = sshll.u32 %s1814_s2, 4  ;;  %s1133_s29 = int_to_ptr.vmem [resolvable:$true] %s1132_s29  ;;  %s1135_s18 = int_to_ptr.hbm [resolvable:$true] %s1134_s18 }
 0x36e   : > { %1254 = dma.vmem_to_hbm [thread:$0]  (%p1265_p12), %s1133_s29, 16, %s1135_s18, [#allocation6]  }
 0x36f   : > { %1451 = dma.done.wait (%p1265_p12), [#allocation6], 16  }
 0x370   : > { %1453 = vsyncadd (%p1265_p12), [#allocation6], 4294967280 }
 0x371 PF: > { %p16_p2 = scmp.ge.s32.totalorder %s1516_s14, 4   ;;  %s1819_s9 = smov %s1460_s10 }
 0x372   : > { %s1820_s10 = smov %s1464_s11  ;;  %s1821_s11 = smov %s1526_s17 }
 0x373   : > { %s1822_s12 = smov %s1516_s14  ;;  %18 = sbr.rel (!%p16_p2) target bundleno = 6 (0x6), region = 87 }
 0x378   :  { %1148 = vsyncpa [#allocation5], 1 }
 0x379   :  { %1150 = vsyncpa [#allocation5 + $0x1], 1 }
 0x37a   :  { %1151 = vsyncpa [#allocation8], 1 }
 0x37b   :  { %1153 = vsyncpa [#allocation8 + $0x1], 1 }
 0x37c   :  { %1154 = vsyncpa [#allocation6], 1 }
 0x37d   :  { %1156 = vsyncpa [#allocation6 + $0x1], 1 }

</bundles_post_ra>
